<compile_context>
chip_gen: v5e
topology: v5e:2x2
jax: 0.10.0
libtpu: 0.0.40
codegen_flags: <defaults>
</compile_context>

<pallas_src>
import functools

import jax
import jax.numpy as jnp
from jax.experimental import pallas as pl
from jax.experimental.pallas import tpu as pltpu

MLP_HIDDEN_SIZE = 10
NUM_CLASSES = 10
INPUT_SIZE = 28 * 28

_LANE = 128      # lane width (last-dim granularity)
_SUBLANE = 8     # f32 sublane granularity (second-to-last dim)
_TM_MAX = 1024   # batch-tile ceiling (fits default scoped VMEM on v5e/v6e/v7x)


def _round_up(x, m):
    return (x + m - 1) // m * m


def _pick_tm(batch):
    """Batch tile size: one tile for small B, >=2 tiles (capped) for large B."""
    if batch < 1024:
        return _round_up(batch, _SUBLANE)                 # single tile
    # At least two tiles so both v7x TensorCores are fed; cap keeps the
    # double-buffered working set inside every generation's default VMEM scope.
    return min(_TM_MAX, _round_up((batch + 1) // 2, _SUBLANE))


def _mlp_kernel(x_ref, w1_ref, b1_ref, w2_ref, b2_ref, w3_ref, b3_ref, o_ref):
    # x tile arrives in its native dtype (f32 here, K=784 unpadded); cast to
    # bf16 in-register so the matmuls run bf16 on the MXU with f32 accumulation.
    x = x_ref[...].astype(jnp.bfloat16)                                # (TM, K)
    h1 = jnp.tanh(
        jnp.dot(x, w1_ref[...], preferred_element_type=jnp.float32) + b1_ref[...]
    )                                                                  # (TM, Hp) f32
    h2 = jnp.tanh(
        jnp.dot(h1.astype(jnp.bfloat16), w2_ref[...],
                preferred_element_type=jnp.float32) + b2_ref[...]
    )                                                                  # (TM, Hp) f32
    out = (
        jnp.dot(h2.astype(jnp.bfloat16), w3_ref[...],
                preferred_element_type=jnp.float32) + b3_ref[...]
    )                                                                  # (TM, Cp) f32
    o_ref[...] = out.astype(o_ref.dtype)


def prepare_params(params):
    """One-time pad+cast of weights/biases. Call once, reuse across forwards."""
    w1, b1, w2, b2, w3, b3 = params
    K, H = w1.shape
    C = w3.shape[1]
    Hp = _round_up(H, _LANE)
    Cp = _round_up(C, _LANE)
    # bf16 matmul operands, zero-padded on the lane (output-feature) dims only;
    # the contraction dim K stays unpadded (784).
    w1_p = jnp.zeros((K, Hp), jnp.bfloat16).at[:, :H].set(w1.astype(jnp.bfloat16))
    w2_p = jnp.zeros((Hp, Hp), jnp.bfloat16).at[:H, :H].set(w2.astype(jnp.bfloat16))
    w3_p = jnp.zeros((Hp, Cp), jnp.bfloat16).at[:H, :C].set(w3.astype(jnp.bfloat16))
    # Biases as zero-padded (1, F) f32 rows -> broadcast over the batch tile.
    b1_p = jnp.zeros((1, Hp), jnp.float32).at[0, :H].set(b1.astype(jnp.float32))
    b2_p = jnp.zeros((1, Hp), jnp.float32).at[0, :H].set(b2.astype(jnp.float32))
    b3_p = jnp.zeros((1, Cp), jnp.float32).at[0, :C].set(b3.astype(jnp.float32))
    return (w1_p, b1_p, w2_p, b2_p, w3_p, b3_p)


@functools.partial(jax.jit, static_argnames=("num_classes",))
def mlp_forward(x, prepared_params, num_classes=NUM_CLASSES):
    """x: (B, ...) -> flattened to (B, -1), like x.view(x.size(0), -1)."""
    w1_p, b1_p, w2_p, b2_p, w3_p, b3_p = prepared_params
    B = x.shape[0]
    x2d = x.reshape(B, -1)                     # native dtype; cast in-kernel
    K = x2d.shape[1]
    Hp = w1_p.shape[1]
    Cp = w3_p.shape[1]
    assert w1_p.shape[0] == K, (w1_p.shape, K)

    TM = _pick_tm(B)
    n_tiles = pl.cdiv(B, TM)
    Bp = n_tiles * TM
    if Bp != B:
        # Only the batch remainder is padded; for B a multiple of TM (the
        # common large-batch case) x goes into the kernel untouched.
        x2d = jnp.pad(x2d, ((0, Bp - B), (0, 0)))

    # Weights/biases: constant block index -> VMEM-resident across batch tiles.
    resident = lambda shape: pl.BlockSpec(shape, lambda i: (0, 0))

    out_slab = pl.pallas_call(
        _mlp_kernel,
        out_shape=jax.ShapeDtypeStruct((Bp, Cp), jnp.float32),
        grid=(n_tiles,),
        in_specs=[
            pl.BlockSpec((TM, K), lambda i: (i, 0)),   # x tiles (pipelined)
            resident((K, Hp)),                          # W1
            resident((1, Hp)),                          # b1
            resident((Hp, Hp)),                         # W2
            resident((1, Hp)),                          # b2
            resident((Hp, Cp)),                         # W3
            resident((1, Cp)),                          # b3
        ],
        out_specs=pl.BlockSpec((TM, Cp), lambda i: (i, 0)),
        compiler_params=pltpu.CompilerParams(
            dimension_semantics=("parallel",),          # megacore-shard batch tiles
        ),
    )(x2d, w1_p, b1_p, w2_p, b2_p, w3_p, b3_p)

    # Slice the real rows / classes out of the lane-dense slab.
    return out_slab[:B, :num_classes]


def init_params(key, input_size=INPUT_SIZE, hidden_size=MLP_HIDDEN_SIZE,
                num_classes=NUM_CLASSES):
    # Deterministic init mimicking nn.Linear's U(-1/sqrt(fan_in), 1/sqrt(fan_in)).
    ks = jax.random.split(key, 6)

    def linear(kw, kb, fan_in, fan_out):
        bound = 1.0 / jnp.sqrt(fan_in)
        w = jax.random.uniform(kw, (fan_in, fan_out), jnp.float32, -bound, bound)
        b = jax.random.uniform(kb, (fan_out,), jnp.float32, -bound, bound)
        return w, b

    w1, b1 = linear(ks[0], ks[1], input_size, hidden_size)
    w2, b2 = linear(ks[2], ks[3], hidden_size, hidden_size)
    w3, b3 = linear(ks[4], ks[5], hidden_size, num_classes)
    return (w1, b1, w2, b2, w3, b3)


def _reference(x, params):
    w1, b1, w2, b2, w3, b3 = params
    x2d = x.reshape(x.shape[0], -1).astype(jnp.float32)
    h1 = jnp.tanh(x2d @ w1 + b1)
    h2 = jnp.tanh(h1 @ w2 + b2)
    return h2 @ w3 + b3


if __name__ == "__main__":
    key = jax.random.PRNGKey(0)
    k_in, k_p = jax.random.split(key)

    # MNIST-like input: (batch=4, channels=1, 28, 28) -> flattened to (4, 784).
    x = jax.random.normal(k_in, (4, 1, 28, 28), dtype=jnp.float32)
    params = init_params(k_p)

    prepared = prepare_params(params)            # one-time pad + bf16 cast
    out = mlp_forward(x, prepared, num_classes=NUM_CLASSES)
    out = jax.block_until_ready(out)

    ref = _reference(x, params)
    assert out.shape == (4, NUM_CLASSES), out.shape
    # bf16 matmul operands with f32 accumulation -> loose tolerance vs f32 ref.
    assert jnp.allclose(out, ref, atol=5e-2, rtol=5e-2), "mismatch vs reference"

    print("KERNEL_OK")
</pallas_src>

<mosaic_0001>
module attributes {stable_mosaic.version = 11 : i64} {
  func.func @_mlp_kernel(%arg0: i32, %arg1: memref<8x784xf32, #tpu.memory_space<vmem>>, %arg2: memref<784x128xbf16, #tpu.memory_space<vmem>>, %arg3: memref<1x128xf32, #tpu.memory_space<vmem>>, %arg4: memref<128x128xbf16, #tpu.memory_space<vmem>>, %arg5: memref<1x128xf32, #tpu.memory_space<vmem>>, %arg6: memref<128x128xbf16, #tpu.memory_space<vmem>>, %arg7: memref<1x128xf32, #tpu.memory_space<vmem>>, %arg8: memref<8x128xf32, #tpu.memory_space<vmem>>) attributes {dimension_semantics = [#tpu.dimension_semantics<parallel>], iteration_bounds = array<i64: 1>, scalar_prefetch = 0 : i64, scratch_operands = 0 : i64, tpu.core_type = #tpu.core_type<tc>, window_params = [{transform_indices = @transform_0, window_bounds = array<i64: 8, 784>}, {pipeline_mode = #tpu.pipeline_mode<synchronous>, transform_indices = @transform_1, window_bounds = array<i64: 784, 128>}, {pipeline_mode = #tpu.pipeline_mode<synchronous>, transform_indices = @transform_2, window_bounds = array<i64: 1, 128>}, {pipeline_mode = #tpu.pipeline_mode<synchronous>, transform_indices = @transform_3, window_bounds = array<i64: 128, 128>}, {pipeline_mode = #tpu.pipeline_mode<synchronous>, transform_indices = @transform_4, window_bounds = array<i64: 1, 128>}, {pipeline_mode = #tpu.pipeline_mode<synchronous>, transform_indices = @transform_5, window_bounds = array<i64: 128, 128>}, {pipeline_mode = #tpu.pipeline_mode<synchronous>, transform_indices = @transform_6, window_bounds = array<i64: 1, 128>}, {transform_indices = @transform_7, window_bounds = array<i64: 8, 128>}]} {
    %c0 = arith.constant 0 : index
    %c0_0 = arith.constant 0 : index
    %0 = vector.load %arg1[%c0, %c0_0] : memref<8x784xf32, #tpu.memory_space<vmem>>, vector<8x784xf32>
    %1 = arith.truncf %0 : vector<8x784xf32> to vector<8x784xbf16>
    %c0_1 = arith.constant 0 : index
    %c0_2 = arith.constant 0 : index
    %2 = vector.load %arg2[%c0_1, %c0_2] : memref<784x128xbf16, #tpu.memory_space<vmem>>, vector<784x128xbf16>
    %cst = arith.constant dense<0.000000e+00> : vector<8x128xf32>
    %3 = tpu.matmul %1, %2, %cst {dimension_numbers = #tpu.dot_dimension_numbers<[1], [0], [0], [1], [0, 0, 1, 1], [], []>} : vector<8x784xbf16>, vector<784x128xbf16>, vector<8x128xf32> -> vector<8x128xf32>
    %c0_3 = arith.constant 0 : index
    %c0_4 = arith.constant 0 : index
    %4 = vector.load %arg3[%c0_3, %c0_4] : memref<1x128xf32, #tpu.memory_space<vmem>>, vector<1x128xf32>
    %5 = vector.broadcast %4 : vector<1x128xf32> to vector<8x128xf32>
    %6 = arith.addf %3, %5 : vector<8x128xf32>
    %7 = math.tanh %6 : vector<8x128xf32>
    %8 = arith.truncf %7 : vector<8x128xf32> to vector<8x128xbf16>
    %c0_5 = arith.constant 0 : index
    %c0_6 = arith.constant 0 : index
    %9 = vector.load %arg4[%c0_5, %c0_6] : memref<128x128xbf16, #tpu.memory_space<vmem>>, vector<128x128xbf16>
    %cst_7 = arith.constant dense<0.000000e+00> : vector<8x128xf32>
    %10 = tpu.matmul %8, %9, %cst_7 {dimension_numbers = #tpu.dot_dimension_numbers<[1], [0], [0], [1], [0, 0, 1, 1], [], []>} : vector<8x128xbf16>, vector<128x128xbf16>, vector<8x128xf32> -> vector<8x128xf32>
    %c0_8 = arith.constant 0 : index
    %c0_9 = arith.constant 0 : index
    %11 = vector.load %arg5[%c0_8, %c0_9] : memref<1x128xf32, #tpu.memory_space<vmem>>, vector<1x128xf32>
    %12 = vector.broadcast %11 : vector<1x128xf32> to vector<8x128xf32>
    %13 = arith.addf %10, %12 : vector<8x128xf32>
    %14 = math.tanh %13 : vector<8x128xf32>
    %15 = arith.truncf %14 : vector<8x128xf32> to vector<8x128xbf16>
    %c0_10 = arith.constant 0 : index
    %c0_11 = arith.constant 0 : index
    %16 = vector.load %arg6[%c0_10, %c0_11] : memref<128x128xbf16, #tpu.memory_space<vmem>>, vector<128x128xbf16>
    %cst_12 = arith.constant dense<0.000000e+00> : vector<8x128xf32>
    %17 = tpu.matmul %15, %16, %cst_12 {dimension_numbers = #tpu.dot_dimension_numbers<[1], [0], [0], [1], [0, 0, 1, 1], [], []>} : vector<8x128xbf16>, vector<128x128xbf16>, vector<8x128xf32> -> vector<8x128xf32>
    %c0_13 = arith.constant 0 : index
    %c0_14 = arith.constant 0 : index
    %18 = vector.load %arg7[%c0_13, %c0_14] : memref<1x128xf32, #tpu.memory_space<vmem>>, vector<1x128xf32>
    %19 = vector.broadcast %18 : vector<1x128xf32> to vector<8x128xf32>
    %20 = arith.addf %17, %19 : vector<8x128xf32>
    %c0_15 = arith.constant 0 : index
    %c0_16 = arith.constant 0 : index
    %21 = vector.load %arg8[%c0_15, %c0_16] : memref<8x128xf32, #tpu.memory_space<vmem>>, vector<8x128xf32>
    tpu.vector_store %arg8[%c0_15, %c0_16], %20 {strides = array<i32>} : memref<8x128xf32, #tpu.memory_space<vmem>>, vector<8x128xf32>,
    return
  }
  func.func @transform_0(%arg0: i32) -> (i32, i32) {
    %c0_i32 = arith.constant 0 : i32
    %c0_i32_0 = arith.constant 0 : i32
    return %arg0, %c0_i32 : i32, i32
  }
  func.func @transform_1(%arg0: i32) -> (i32, i32) {
    %c0_i32 = arith.constant 0 : i32
    %c0_i32_0 = arith.constant 0 : i32
    %c0_i32_1 = arith.constant 0 : i32
    return %c0_i32, %c0_i32_0 : i32, i32
  }
  func.func @transform_2(%arg0: i32) -> (i32, i32) {
    %c0_i32 = arith.constant 0 : i32
    %c0_i32_0 = arith.constant 0 : i32
    %c0_i32_1 = arith.constant 0 : i32
    return %c0_i32, %c0_i32_0 : i32, i32
  }
  func.func @transform_3(%arg0: i32) -> (i32, i32) {
    %c0_i32 = arith.constant 0 : i32
    %c0_i32_0 = arith.constant 0 : i32
    %c0_i32_1 = arith.constant 0 : i32
    return %c0_i32, %c0_i32_0 : i32, i32
  }
  func.func @transform_4(%arg0: i32) -> (i32, i32) {
    %c0_i32 = arith.constant 0 : i32
    %c0_i32_0 = arith.constant 0 : i32
    %c0_i32_1 = arith.constant 0 : i32
    return %c0_i32, %c0_i32_0 : i32, i32
  }
  func.func @transform_5(%arg0: i32) -> (i32, i32) {
    %c0_i32 = arith.constant 0 : i32
    %c0_i32_0 = arith.constant 0 : i32
    %c0_i32_1 = arith.constant 0 : i32
    return %c0_i32, %c0_i32_0 : i32, i32
  }
  func.func @transform_6(%arg0: i32) -> (i32, i32) {
    %c0_i32 = arith.constant 0 : i32
    %c0_i32_0 = arith.constant 0 : i32
    %c0_i32_1 = arith.constant 0 : i32
    return %c0_i32, %c0_i32_0 : i32, i32
  }
  func.func @transform_7(%arg0: i32) -> (i32, i32) {
    %c0_i32 = arith.constant 0 : i32
    %c0_i32_0 = arith.constant 0 : i32
    return %arg0, %c0_i32 : i32, i32
  }
}

</mosaic_0001>

<bundles_post_ra>
// kernel: mlp_forward.1
= control target key start
LH: loop header
LB: loop body
LE: loop exit
PB: predicated region body
PF: predicated region fallthrough
CT: control target
= control target key end

     0   :  { %12 = vsyncpa [#allocation3], 0  ;;  %s1082_s27 = smov [#allocation2]   ;;  %s1083_s29 = smov 64   ;;  %s1332_s0 = inlined_call_operand.vmem [shape: f32[8,784], index: 0, kind: input, shape index: {}]   ;;  %s1333_s1 = inlined_call_operand.vmem [shape: bf16[784,128], index: 1, kind: input, shape index: {}]   ;;  %s1334_s2 = inlined_call_operand.vmem [shape: f32[1,128], index: 2, kind: input, shape index: {}]   ;;  %s1335_s3 = inlined_call_operand.vmem [shape: bf16[128,128], index: 3, kind: input, shape index: {}]   ;;  %s1336_s4 = inlined_call_operand.vmem [shape: f32[1,128], index: 4, kind: input, shape index: {}]   ;;  %s1337_s5 = inlined_call_operand.hbm [shape: bf16[128,128], index: 5, kind: input, shape index: {}]   ;;  %s1338_s6 = inlined_call_operand.vmem [shape: f32[1,128], index: 6, kind: input, shape index: {}]   ;;  %s1339_s7 = inlined_call_operand.vmem [shape: f32[8,128], index: 7, kind: output, shape index: {}]  }
   0x1   :  { %s27_s26 = sshll.u32 %s1337_s5, 4  ;;  %s29_s28 = sshll.u32 %s1082_s27, 4  ;;  %s28_s26 = int_to_ptr.hbm [resolvable:$true] %s27_s26  ;;  %s30_s28 = int_to_ptr.vmem [resolvable:$true] %s29_s28 }
   0x2   :  { %s1084_s30 = smov 4  }
   0x3   :  { %35 = dma.hbm_to_vmem [thread:$0]  %s28_s26, 1024, %s30_s28, [#allocation3], %s1083_s29, %s1083_s29, %s1084_s30  }
   0x4   :  { %1080 = dma.done.wait [#allocation3], 1024  }
   0x5   :  { %1081 = vsyncadd [#allocation3], 4294966272  ;;  %v988_v0 = vld [vmem:[%s1333_s1 + $0x38] sm:$0xff]  ;;  %v987_v3 = vld [vmem:[%s1333_s1 + $0x30] sm:$0xff]  ;;  %vm453_vm0 = vcmask 130048  }
   0x6   :  { %v996_v1 = vld [vmem:[%s1333_s1 + $0x78] sm:$0xff]  ;;  %457 = vmatpush.bf16.msra.mxu0 %v988_v0  ;;  %v995_v4 = vld [vmem:[%s1333_s1 + $0x70] sm:$0xff]  ;;  %v986_v8 = vld [vmem:[%s1333_s1 + $0x28] sm:$0xff] }
   0x7   :  { %v1004_v2 = vld [vmem:[%s1333_s1 + $0xb8] sm:$0xff]  ;;  %470 = vmatpush.bf16.msra.mxu1 %v996_v1  ;;  %v1003_v5 = vld [vmem:[%s1333_s1 + $0xb0] sm:$0xff]  ;;  %v994_v9 = vld [vmem:[%s1333_s1 + $0x68] sm:$0xff] }
   0x8   :  { %483 = vmatpush.bf16.msra.mxu2 %v1004_v2  ;;  %v1012_v6 = vld [vmem:[%s1333_s1 + $0xf8] sm:$0xff]  ;;  %v1011_v7 = vld [vmem:[%s1333_s1 + $0xf0] sm:$0xff]  ;;  %v1002_v10 = vld [vmem:[%s1333_s1 + $0xa8] sm:$0xff] }
   0x9   :  { %496 = vmatpush.bf16.msra.mxu3 %v1012_v6  ;;  %v1010_v11 = vld [vmem:[%s1333_s1 + $0xe8] sm:$0xff]  ;;  %v985_v12 = vld [vmem:[%s1333_s1 + $0x20] sm:$0xff]  ;;  %v984_v16 = vld [vmem:[%s1333_s1 + $0x18] sm:$0xff] }
   0xa   :  { %458 = vmatpush.bf16.msra.mxu0 %v987_v3  ;;  %v993_v13 = vld [vmem:[%s1333_s1 + $0x60] sm:$0xff]  ;;  %v992_v17 = vld [vmem:[%s1333_s1 + $0x58] sm:$0xff]  ;;  %v983_v20 = vld [vmem:[%s1333_s1 + $0x10] sm:$0xff] }
   0xb   :  { %471 = vmatpush.bf16.msra.mxu1 %v995_v4  ;;  %v1001_v14 = vld [vmem:[%s1333_s1 + $0xa0] sm:$0xff]  ;;  %v1000_v18 = vld [vmem:[%s1333_s1 + $0x98] sm:$0xff]  ;;  %v991_v21 = vld [vmem:[%s1333_s1 + $0x50] sm:$0xff] }
   0xc   :  { %484 = vmatpush.bf16.msra.mxu2 %v1003_v5  ;;  %v1009_v15 = vld [vmem:[%s1333_s1 + $0xe0] sm:$0xff]  ;;  %v1008_v19 = vld [vmem:[%s1333_s1 + $0xd8] sm:$0xff]  ;;  %v999_v22 = vld [vmem:[%s1333_s1 + $0x90] sm:$0xff] }
   0xd   :  { %497 = vmatpush.bf16.msra.mxu3 %v1011_v7  ;;  %v1007_v23 = vld [vmem:[%s1333_s1 + $0xd0] sm:$0xff]  ;;  %v982_v24 = vld [vmem:[%s1333_s1 + $0x8] sm:$0xff]  ;;  %v981_v27 = vld [vmem:[%s1333_s1] sm:$0xff] }
   0xe   :  { %459 = vmatpush.bf16.msra.mxu0 %v986_v8  ;;  %v990_v25 = vld [vmem:[%s1333_s1 + $0x48] sm:$0xff]  ;;  %v989_v29 = vld [vmem:[%s1333_s1 + $0x40] sm:$0xff]  ;;  %v1020_v32 = vld [vmem:[%s1333_s1 + $0x138] sm:$0xff] }
   0xf   :  { %472 = vmatpush.bf16.msra.mxu1 %v994_v9  ;;  %v998_v26 = vld [vmem:[%s1333_s1 + $0x88] sm:$0xff]  ;;  %v43_v30 = vld [vmem:[%s1332_s0] sm:$0xff]  ;;  %v1028_v33 = vld [vmem:[%s1333_s1 + $0x178] sm:$0xff] }
  0x10   :  { %485 = vmatpush.bf16.msra.mxu2 %v1002_v10  ;;  %v1006_v28 = vld [vmem:[%s1333_s1 + $0xc8] sm:$0xff]  ;;  %v997_v34 = vld [vmem:[%s1333_s1 + $0x80] sm:$0xff]  ;;  %v45_v35 = vld [vmem:[%s1332_s0 + $0x10] sm:$0xff]  ;;  %v50_v36 = vpack.c.bf16 %v43_v30, %v43_v30 }
  0x11   :  { %498 = vmatpush.bf16.msra.mxu3 %v1010_v11  ;;  %v44_v31 = vld [vmem:[%s1332_s0 + $0x8] sm:$0xff]  ;;  %v1005_v38 = vld [vmem:[%s1333_s1 + $0xc0] sm:$0xff]  ;;  %v46_v40 = vld [vmem:[%s1332_s0 + $0x18] sm:$0xff]  ;;  %v52_v43 = vpack.c.bf16 %v45_v35, %v45_v35 }
  0x12   :  { %460 = vmatpush.bf16.msra.mxu0 %v985_v12  ;;  %v51_v37 = vpack.c.bf16 %v44_v31, %v44_v31  ;;  %v1029_v39 = vld [vmem:[%s1333_s1 + $0x180] sm:$0xff]  ;;  %v1019_v41 = vld [vmem:[%s1333_s1 + $0x130] sm:$0xff]  ;;  %v53_v44 = vpack.c.bf16 %v46_v40, %v46_v40  ;;  %v1018_v45 = vld [vmem:[%s1333_s1 + $0x128] sm:$0xff] }
  0x13   :  { %473 = vmatpush.bf16.msra.mxu1 %v993_v13  ;;  %v1027_v42 = vld [vmem:[%s1333_s1 + $0x170] sm:$0xff]  ;;  %v1026_v46 = vld [vmem:[%s1333_s1 + $0x168] sm:$0xff]  ;;  %v1017_v47 = vld [vmem:[%s1333_s1 + $0x120] sm:$0xff] }
  0x14   :  { %486 = vmatpush.bf16.msra.mxu2 %v1001_v14  ;;  %v1025_v48 = vld [vmem:[%s1333_s1 + $0x160] sm:$0xff]  ;;  %v1016_v49 = vld [vmem:[%s1333_s1 + $0x118] sm:$0xff]  ;;  %v49_v51 = vld [vmem:[%s1332_s0 + $0x30] sm:$0xff] }
  0x15   :  { %499 = vmatpush.bf16.msra.mxu3 %v1009_v15  ;;  %v1024_v50 = vld [vmem:[%s1333_s1 + $0x158] sm:$0xff]  ;;  %v1015_v52 = vld [vmem:[%s1333_s1 + $0x110] sm:$0xff]  ;;  %v56_v54 = vpack.c.bf16 %v49_v51, %v49_v51  ;;  %v1014_v55 = vld [vmem:[%s1333_s1 + $0x108] sm:$0xff] }
  0x16   :  { %461 = vmatpush.bf16.msra.mxu0 %v984_v16  ;;  %v1023_v53 = vld [vmem:[%s1333_s1 + $0x150] sm:$0xff]  ;;  %v1022_v56 = vld [vmem:[%s1333_s1 + $0x148] sm:$0xff]  ;;  %v1013_v57 = vld [vmem:[%s1333_s1 + $0x100] sm:$0xff] }
  0x17   :  { %474 = vmatpush.bf16.msra.mxu1 %v992_v17  ;;  %v1021_v58 = vld [vmem:[%s1333_s1 + $0x140] sm:$0xff]  ;;  %v48_v60 = vld [vmem:[%s1332_s0 + $0x28] sm:$0xff]  ;;  %v1037_v63 = vld [vmem:[%s1335_s3 + $0x38] sm:$0xff] }
  0x18   :  { %487 = vmatpush.bf16.msra.mxu2 %v1000_v18  ;;  %v47_v59 = vld [vmem:[%s1332_s0 + $0x20] sm:$0xff]  ;;  %v55_v62 = vpack.c.bf16 %v48_v60, %v48_v60  ;;  %v1036_v0 = vld [vmem:[%s1335_s3 + $0x30] sm:$0xff]  ;;  %v1035_v1 = vld [vmem:[%s1335_s3 + $0x28] sm:$0xff] }
  0x19   :  { %500 = vmatpush.bf16.msra.mxu3 %v1008_v19  ;;  %v54_v61 = vpack.c.bf16 %v47_v59, %v47_v59  ;;  %v1034_v2 = vld [vmem:[%s1335_s3 + $0x20] sm:$0xff]  ;;  %v1033_v3 = vld [vmem:[%s1335_s3 + $0x18] sm:$0xff]  ;;  %v1032_v6 = vld [vmem:[%s1335_s3 + $0x10] sm:$0xff] }
  0x1a   :  { %462 = vmatpush.bf16.msra.mxu0 %v983_v20  ;;  %v1031_v7 = vld [vmem:[%s1335_s3 + $0x8] sm:$0xff]  ;;  %v1030_v8 = vld [vmem:[%s1335_s3] sm:$0xff]  ;;  %v1045_v14 = vld [vmem:[#allocation2 + $0x38] sm:$0xff] }
  0x1b   :  { %475 = vmatpush.bf16.msra.mxu1 %v991_v21  ;;  %v1049_v13 = vld [vmem:[%s1334_s2] ss:$0 sm:$0xff]  ;;  %v1044_v15 = vld [vmem:[#allocation2 + $0x30] sm:$0xff]  ;;  %v1043_v19 = vld [vmem:[#allocation2 + $0x28] sm:$0xff] }
  0x1c   :  { %488 = vmatpush.bf16.msra.mxu2 %v999_v22  ;;  %v1042_v21 = vld [vmem:[#allocation2 + $0x20] sm:$0xff] }
  0x1d   :  { %501 = vmatpush.bf16.msra.mxu3 %v1007_v23 }
  0x1e   :  { %463 = vmatpush.bf16.msra.mxu0 %v982_v24  ;;  %v1041_v24 = vld [vmem:[#allocation2 + $0x18] sm:$0xff] }
  0x1f   :  { %476 = vmatpush.bf16.msra.mxu1 %v990_v25 }
  0x20   :  { %489 = vmatpush.bf16.msra.mxu2 %v998_v26 }
  0x21   :  { %502 = vmatpush.bf16.msra.mxu3 %v1006_v28 }
  0x22   :  { %464 = vmatpush.bf16.msra.mxu0 %v981_v27 }
  0x23   :  { %477 = vmatpush.bf16.msra.mxu1 %v989_v29 }
  0x24   :  { %490 = vmatpush.bf16.msra.mxu2 %v997_v34 }
  0x25   :  { %465 = vmatmul.bf16.vlgmr.msra.gmra.mxu0 %v50_v36  ;;  %503 = vmatpush.bf16.msra.mxu3 %v1005_v38  ;;  %v1040_v36 = vld [vmem:[#allocation2 + $0x10] sm:$0xff]  ;;  %v1038_v38 = vld [vmem:[#allocation2] sm:$0xff] }
  0x26   :  { %509 = vmatpush.bf16.msrb.mxu0 %v1020_v32  ;;  %478 = vmatmul.bf16.vlgmr.msra.gmra.mxu1 %v51_v37  ;;  %v1039_v37 = vld [vmem:[#allocation2 + $0x8] sm:$0xff] }
  0x27   :  { %522 = vmatpush.bf16.msrb.mxu1 %v1028_v33  ;;  %491 = vmatmul.bf16.vlgmr.msra.gmra.mxu2 %v52_v43 }
  0x28   :  { %542 = vmatpush.bf16.msrb.mxu2 %v1029_v39  ;;  %504 = vmatmul.bf16.vlgmr.msra.gmra.mxu3 %v53_v44  ;;  %v1050_v39 = vld [vmem:[%s1336_s4] ss:$0 sm:$0xff] }
  0x29   :  { %618 = vmatpush.bf16.msrb.mxu3 %v1037_v63 }
  0x2a   :  { %510 = vmatpush.bf16.msrb.mxu0 %v1019_v41 }
  0x2b   :  { %523 = vmatpush.bf16.msrb.mxu1 %v1027_v42 }
  0x2c   :  { %701 = vmatpush.bf16.msra.mxu2 %v1045_v14 }
  0x2d   :  { %619 = vmatpush.bf16.msrb.mxu3 %v1036_v0 }
  0x2e   :  { %511 = vmatpush.bf16.msrb.mxu0 %v1018_v45  ;;  %v1051_v45 = vld [vmem:[%s1338_s6] ss:$0 sm:$0xff] }
  0x2f   :  { %524 = vmatpush.bf16.msrb.mxu1 %v1026_v46 }
  0x30   :  { %702 = vmatpush.bf16.msra.mxu2 %v1044_v15 }
  0x31   :  { %620 = vmatpush.bf16.msrb.mxu3 %v1035_v1 }
  0x32   :  { %512 = vmatpush.bf16.msrb.mxu0 %v1017_v47 }
  0x33   :  { %525 = vmatpush.bf16.msrb.mxu1 %v1025_v48 }
  0x34   :  { %703 = vmatpush.bf16.msra.mxu2 %v1043_v19 }
  0x35   :  { %621 = vmatpush.bf16.msrb.mxu3 %v1034_v2 }
  0x36   :  { %513 = vmatpush.bf16.msrb.mxu0 %v1016_v49 }
  0x37   :  { %526 = vmatpush.bf16.msrb.mxu1 %v1024_v50  ;;  %916 = vmatmul.msk.bf16.vlgmr.msrb.gmra.mxu2 %vm453_vm0, %v56_v54 }
  0x38   :  { %704 = vmatpush.bf16.msra.mxu2 %v1042_v21 }
  0x39   :  { %622 = vmatpush.bf16.msrb.mxu3 %v1033_v3 }
  0x3a   :  { %514 = vmatpush.bf16.msrb.mxu0 %v1015_v52 }
  0x3b   :  { %527 = vmatpush.bf16.msrb.mxu1 %v1023_v53 }
  0x3c   :  { %705 = vmatpush.bf16.msra.mxu2 %v1041_v24 }
  0x3d   :  { %623 = vmatpush.bf16.msrb.mxu3 %v1032_v6 }
  0x3e   :  { %515 = vmatpush.bf16.msrb.mxu0 %v1014_v55 }
  0x3f   :  { %528 = vmatpush.bf16.msrb.mxu1 %v1022_v56 }
  0x40   :  { %706 = vmatpush.bf16.msra.mxu2 %v1040_v36 }
  0x41   :  { %624 = vmatpush.bf16.msrb.mxu3 %v1031_v7 }
  0x42   :  { %516 = vmatpush.bf16.msrb.mxu0 %v1013_v57 }
  0x43   :  { %529 = vmatpush.bf16.msrb.mxu1 %v1021_v58 }
  0x44   :  { %707 = vmatpush.bf16.msra.mxu2 %v1039_v37 }
  0x45   :  { %517 = vmatmul.bf16.vlgmr.msrb.gmra.mxu0 %v54_v61  ;;  %625 = vmatpush.bf16.msrb.mxu3 %v1030_v8 }
  0x46   :  { %530 = vmatmul.bf16.vlgmr.msrb.gmra.mxu1 %v55_v62 }
  0x48   :  { %708 = vmatpush.bf16.msra.mxu2 %v1038_v38 }
  0xa2   :  { %v466_v4 = vpop.f32.mrf.mxu0 }
  0xa3   :  { %v479_v5 = vpop.f32.mrf.mxu1  ;;  %v467_v16 = vadd.f32 %v1049_v13, %v466_v4 }
  0xa5   :  { %v480_v20 = vadd.f32 %v479_v5, %v467_v16 }
  0xaa   :  { %v468_v9 = vpop.f32.mrf.mxu0  ;;  %v492_v11 = vpop.f32.mrf.mxu2 }
  0xab   :  { %v481_v10 = vpop.f32.mrf.mxu1  ;;  %v505_v12 = vpop.f32.mrf.mxu3  ;;  %v493_v22 = vadd.f32 %v492_v11, %v480_v20 }
  0xad   :  { %v506_v25 = vadd.f32 %v505_v12, %v493_v22 }
  0xb2   :  { %v494_v17 = vpop.f32.mrf.mxu2 }
  0xb3   :  { %v507_v18 = vpop.f32.mrf.mxu3 }
  0xba   :  { %v544_v23 = vpop.f32.mrf.mxu2 }
  0xc2   :  { %v518_v26 = vpop.f32.mrf.mxu0  ;;  %v546_v30 = vpop.f32.mrf.mxu2 }
  0xc3   :  { %v531_v27 = vpop.f32.mrf.mxu1  ;;  %v519_v28 = vadd.f32 %v518_v26, %v506_v25 }
  0xc5   :  { %v532_v29 = vadd.f32 %v531_v27, %v519_v28 }
  0xc7   :  { %v545_v31 = vadd.f32 %v544_v23, %v532_v29 }
  0xc9   :  { %1052 = vtanh.f32 %v545_v31 }
  0xca   :  { %v520_v32 = vpop.f32.mrf.mxu0 }
  0xcb   :  { %v533_v33 = vpop.f32.mrf.mxu1 }
  0xcf   :  { %v1053_v34 = vpop.eup %1052 }
  0xd0   :  { %v549_v35 = vpack.c.bf16 %v1053_v34, %v1053_v34 }
  0xd2   :  { %626 = vmatmul.bf16.vlgmr.msrb.gmra.mxu3 %v549_v35 }
 0x155   :  { %v627_v40 = vpop.f32.mrf.mxu3 }
 0x156   :  { %v628_v41 = vadd.f32 %v1050_v39, %v627_v40 }
 0x158   :  { %1054 = vtanh.f32 %v628_v41 }
 0x15d   :  { %v629_v42 = vpop.f32.mrf.mxu3 }
 0x15e   :  { %v1055_v43 = vpop.eup %1054 }
 0x15f   :  { %v632_v44 = vpack.c.bf16 %v1055_v43, %v1055_v43 }
 0x161   :  { %709 = vmatmul.bf16.vlgmr.msra.gmra.mxu2 %v632_v44 }
 0x1e4   :  { %v710_v46 = vpop.f32.mrf.mxu2 }
 0x1e5   :  { %v711_v47 = vadd.f32 %v1051_v45, %v710_v46 }
 0x1e7   :  { %714 = vst [vmem:[%s1339_s7] sm:$0xff] %v711_v47 }
 0x1ec   :  { %v712_v48 = vpop.f32.mrf.mxu2 }
 0x1ed   :  { %719 = vsyncpa [#allocation3], 1 }

</bundles_post_ra>
